<compile_context>
chip_gen: v5e
topology: v5e:2x2
jax: 0.10.0
libtpu: 0.0.40
codegen_flags: <defaults>
</compile_context>

<pallas_src>
import jax
import jax.numpy as jnp
from jax.experimental import pallas as pl
from jax.experimental.pallas import tpu as pltpu


def _round_up(x, m):
    return (x + m - 1) // m * m


# ----------------------------------------------------------------------------
# Pallas kernel: tiled matmul + folded-BN + ReLU  (MXU)
# ----------------------------------------------------------------------------
def _matmul_bn_relu_kernel(x_ref, w_ref, s_ref, b_ref, o_ref, acc_ref):
    @pl.when(pl.program_id(2) == 0)
    def _():
        acc_ref[...] = jnp.zeros_like(acc_ref)

    acc_ref[...] += jnp.dot(
        x_ref[...], w_ref[...], preferred_element_type=jnp.float32
    )

    @pl.when(pl.program_id(2) == pl.num_programs(2) - 1)
    def _():
        # BN + ReLU epilogue runs once per (tm, tn) output tile.
        o_ref[...] = jnp.maximum(acc_ref[...] * s_ref[...] + b_ref[...], 0.0)


def matmul_bn_relu(x, w, scale, bias, *, tm=256, tn=256, tk=256):
    """relu((x @ w) * scale + bias).  x:(M,K) w:(K,N) scale/bias:(N,) -> (M,N) f32."""
    M, K = x.shape
    Kw, N = w.shape
    assert K == Kw

    # Pad to tile-friendly sizes (zero padding is exact for matmul; padded
    # output rows/cols are sliced off).
    Mp = _round_up(M, 8)
    tm = min(tm, Mp)
    Mp = _round_up(Mp, tm)
    Np = _round_up(N, 128)
    tn = min(tn, Np)
    Np = _round_up(Np, tn)
    Kp = _round_up(K, 128)
    tk = min(tk, Kp)
    Kp = _round_up(Kp, tk)

    # bf16 MXU inputs; f32 accumulator + BN params (v6e/v7x peak, v5e-safe).
    xp = jnp.pad(x, ((0, Mp - M), (0, Kp - K))).astype(jnp.bfloat16)
    wp = jnp.pad(w, ((0, Kp - K), (0, Np - N))).astype(jnp.bfloat16)
    sp = jnp.pad(scale.astype(jnp.float32), (0, Np - N)).reshape(1, Np)
    bp = jnp.pad(bias.astype(jnp.float32), (0, Np - N)).reshape(1, Np)

    grid = (Mp // tm, Np // tn, Kp // tk)
    cost = pl.CostEstimate(
        flops=2 * Mp * Np * Kp,
        transcendentals=0,
        bytes_accessed=int(xp.size * 2 + wp.size * 2 + Mp * Np * 4 + 2 * Np * 4),
    )

    out = pl.pallas_call(
        _matmul_bn_relu_kernel,
        out_shape=jax.ShapeDtypeStruct((Mp, Np), jnp.float32),
        grid_spec=pltpu.PrefetchScalarGridSpec(
            num_scalar_prefetch=0,
            grid=grid,
            in_specs=[
                pl.BlockSpec((tm, tk), lambda i, j, k: (i, k)),
                pl.BlockSpec((tk, tn), lambda i, j, k: (k, j)),
                pl.BlockSpec((1, tn), lambda i, j, k: (0, j)),
                pl.BlockSpec((1, tn), lambda i, j, k: (0, j)),
            ],
            out_specs=pl.BlockSpec((tm, tn), lambda i, j, k: (i, j)),
            scratch_shapes=[pltpu.VMEM((tm, tn), jnp.float32)],
        ),
        compiler_params=pltpu.CompilerParams(
            dimension_semantics=("parallel", "parallel", "arbitrary")
        ),
        cost_estimate=cost,
    )(xp, wp, sp, bp)
    return out[:M, :N]


# ----------------------------------------------------------------------------
# Pallas kernel: 2x2 max-pool (VPU elementwise max of the 4 window slabs)
# ----------------------------------------------------------------------------
def _maxpool_kernel(x_ref, o_ref):
    o_ref[...] = jnp.max(x_ref[...], axis=0)


def maxpool2x2(x):
    """x: NHWC with even H, W -> (N, H//2, W//2, C) f32."""
    N, H, W, C = x.shape
    Ho, Wo = H // 2, W // 2
    M = N * Ho * Wo
    slabs = jnp.stack(
        [
            x[:, 0::2, 0::2, :],
            x[:, 0::2, 1::2, :],
            x[:, 1::2, 0::2, :],
            x[:, 1::2, 1::2, :],
        ],
        axis=0,
    ).reshape(4, M, C)

    Mp = _round_up(M, 8)
    tm = min(1024, Mp)
    Mp = _round_up(Mp, tm)
    slabs = jnp.pad(slabs, ((0, 0), (0, Mp - M), (0, 0)))

    out = pl.pallas_call(
        _maxpool_kernel,
        out_shape=jax.ShapeDtypeStruct((Mp, C), jnp.float32),
        grid=(Mp // tm,),
        in_specs=[pl.BlockSpec((4, tm, C), lambda i: (0, i, 0))],
        out_specs=pl.BlockSpec((tm, C), lambda i: (i, 0)),
        compiler_params=pltpu.CompilerParams(dimension_semantics=("parallel",)),
    )(slabs)
    return out[:M].reshape(N, Ho, Wo, C)


# ----------------------------------------------------------------------------
# Glue (padding / im2col patch extraction) in plain JAX
# ----------------------------------------------------------------------------
def _pad_hw(x):
    # NHWC, pad=1 on H and W (matches Conv2d padding=1)
    return jnp.pad(x, ((0, 0), (1, 1), (1, 1), (0, 0)))


def _extract_patches(xp):
    """xp: padded NHWC -> (N, Ho, Wo, 9, C); taps ordered dy*3+dx (row-major),
    matching PyTorch conv weight (kh, kw) ordering."""
    N, Hp, Wp, C = xp.shape
    Ho, Wo = Hp - 2, Wp - 2
    taps = []
    for dy in range(3):
        for dx in range(3):
            taps.append(xp[:, dy:dy + Ho, dx:dx + Wo, :])
    return jnp.stack(taps, axis=3)  # (N, Ho, Wo, 9, C)


def _conv3x3_bn_relu(x_nhwc, w_mat, scale, bias):
    """3x3 conv (pad 1, stride 1) via im2col + fused matmul kernel."""
    patches = _extract_patches(_pad_hw(x_nhwc))  # (N,Ho,Wo,9,Cin)
    N, Ho, Wo, T, Cin = patches.shape
    xm = patches.reshape(N * Ho * Wo, T * Cin)
    y = matmul_bn_relu(xm, w_mat, scale, bias)
    return y.reshape(N, Ho, Wo, -1)


# ----------------------------------------------------------------------------
# Deterministic parameter init (BN folded to per-channel scale/bias, eval mode)
# ----------------------------------------------------------------------------
def _fold_bn(key, c):
    kg, kb, km, kv = jax.random.split(key, 4)
    gamma = jax.random.uniform(kg, (c,), minval=0.5, maxval=1.5)
    beta = 0.1 * jax.random.normal(kb, (c,))
    mean = 0.1 * jax.random.normal(km, (c,))
    var = jax.random.uniform(kv, (c,), minval=0.5, maxval=1.5)
    scale = gamma / jnp.sqrt(var + 1e-5)
    bias = beta - mean * scale
    return scale.astype(jnp.float32), bias.astype(jnp.float32)


def init_down_params(key, in_channels, out_channels, groups=32):
    mid = out_channels  # DoubleConv default: mid_channels = out_channels
    assert mid % groups == 0 and out_channels % groups == 0
    k1, k2, k3, k4 = jax.random.split(key, 4)

    # conv1: dense 3x3, (3,3,Cin,Cmid) -> (9*Cin, Cmid)
    w1 = jax.random.normal(k1, (3, 3, in_channels, mid)) / jnp.sqrt(9.0 * in_channels)
    w1 = w1.reshape(9 * in_channels, mid).astype(jnp.float32)
    s1, b1 = _fold_bn(k2, mid)

    # conv2: grouped 3x3 (groups=32) as an exact block-diagonal dense matmul
    # (keeps the MXU lane-dense; for very large channel counts a group-tiled
    # kernel would avoid the structural zero FLOPs).
    ci = mid // groups
    co = out_channels // groups
    wg = jax.random.normal(k3, (groups, 9, ci, co)) / jnp.sqrt(9.0 * ci)
    w2 = jnp.zeros((9, mid, out_channels), jnp.float32)
    for g in range(groups):
        w2 = w2.at[:, g * ci:(g + 1) * ci, g * co:(g + 1) * co].set(
            wg[g].astype(jnp.float32))
    w2 = w2.reshape(9 * mid, out_channels)
    s2, b2 = _fold_bn(k4, out_channels)

    return {"w1": w1, "s1": s1, "b1": b1, "w2": w2, "s2": s2, "b2": b2}


# ----------------------------------------------------------------------------
# Full forward:  maxpool -> (conv3x3 + BN + ReLU) -> (grouped conv3x3 + BN + ReLU)
# ----------------------------------------------------------------------------
def down_forward(params, x_nchw):
    x = jnp.transpose(x_nchw, (0, 2, 3, 1)).astype(jnp.float32)  # NCHW -> NHWC
    x = maxpool2x2(x)
    x = _conv3x3_bn_relu(x, params["w1"], params["s1"], params["b1"])
    x = _conv3x3_bn_relu(x, params["w2"], params["s2"], params["b2"])
    return jnp.transpose(x, (0, 3, 1, 2))  # NHWC -> NCHW


if __name__ == "__main__":
    N, C_in, H, W = 2, 4, 16, 16
    C_out = 64  # must be divisible by groups=32 (DoubleConv grouped conv)

    key = jax.random.PRNGKey(0)
    k_params, k_x = jax.random.split(key)
    params = init_down_params(k_params, C_in, C_out)
    x = jax.random.normal(k_x, (N, C_in, H, W), dtype=jnp.float32)

    fwd = jax.jit(down_forward)
    out = fwd(params, x)
    jax.block_until_ready(out)

    assert out.shape == (N, C_out, H // 2, W // 2), out.shape
    assert out.dtype == jnp.float32
    assert bool(jnp.all(jnp.isfinite(out)))
    assert bool(jnp.all(out >= 0.0))  # ReLU range
    print("KERNEL_OK")
</pallas_src>

<mosaic_0001>
module attributes {stable_mosaic.version = 11 : i64} {
  func.func @_maxpool_kernel(%arg0: i32, %arg1: memref<4x128x4xf32, #tpu.memory_space<vmem>>, %arg2: memref<128x4xf32, #tpu.memory_space<vmem>>) attributes {dimension_semantics = [#tpu.dimension_semantics<parallel>], iteration_bounds = array<i64: 1>, scalar_prefetch = 0 : i64, scratch_operands = 0 : i64, tpu.core_type = #tpu.core_type<tc>, window_params = [{transform_indices = @transform_0, window_bounds = array<i64: 4, 128, 4>}, {transform_indices = @transform_1, window_bounds = array<i64: 128, 4>}]} {
    %c0 = arith.constant 0 : index
    %c0_0 = arith.constant 0 : index
    %c0_1 = arith.constant 0 : index
    %0 = vector.load %arg1[%c0, %c0_0, %c0_1] : memref<4x128x4xf32, #tpu.memory_space<vmem>>, vector<4x128x4xf32>
    %cst = arith.constant dense<0xFF800000> : vector<128x4xf32>
    %1 = vector.multi_reduction <maximumf>, %0, %cst [0] : vector<4x128x4xf32> to vector<128x4xf32>
    %c0_2 = arith.constant 0 : index
    %c0_3 = arith.constant 0 : index
    %2 = vector.load %arg2[%c0_2, %c0_3] : memref<128x4xf32, #tpu.memory_space<vmem>>, vector<128x4xf32>
    tpu.vector_store %arg2[%c0_2, %c0_3], %1 {strides = array<i32>} : memref<128x4xf32, #tpu.memory_space<vmem>>, vector<128x4xf32>,
    return
  }
  func.func @transform_0(%arg0: i32) -> (i32, i32, i32) {
    %c0_i32 = arith.constant 0 : i32
    %c0_i32_0 = arith.constant 0 : i32
    %c0_i32_1 = arith.constant 0 : i32
    return %c0_i32, %arg0, %c0_i32_0 : i32, i32, i32
  }
  func.func @transform_1(%arg0: i32) -> (i32, i32) {
    %c0_i32 = arith.constant 0 : i32
    %c0_i32_0 = arith.constant 0 : i32
    return %arg0, %c0_i32 : i32, i32
  }
}

module attributes {stable_mosaic.version = 11 : i64} {
  func.func @_matmul_bn_relu_kernel(%arg0: i32, %arg1: i32, %arg2: i32, %arg3: memref<128x128xbf16, #tpu.memory_space<vmem>>, %arg4: memref<128x128xbf16, #tpu.memory_space<vmem>>, %arg5: memref<1x128xf32, #tpu.memory_space<vmem>>, %arg6: memref<1x128xf32, #tpu.memory_space<vmem>>, %arg7: memref<128x128xf32, #tpu.memory_space<vmem>>, %arg8: memref<128x128xf32, #tpu.memory_space<vmem>>) attributes {dimension_semantics = [#tpu.dimension_semantics<parallel>, #tpu.dimension_semantics<parallel>, #tpu.dimension_semantics<arbitrary>], iteration_bounds = array<i64: 1, 1, 1>, scalar_prefetch = 0 : i64, scratch_operands = 1 : i64, tpu.core_type = #tpu.core_type<tc>, window_params = [{transform_indices = @transform_0, window_bounds = array<i64: 128, 128>}, {transform_indices = @transform_1, window_bounds = array<i64: 128, 128>}, {transform_indices = @transform_2, window_bounds = array<i64: 1, 128>}, {transform_indices = @transform_3, window_bounds = array<i64: 1, 128>}, {transform_indices = @transform_4, window_bounds = array<i64: 128, 128>}]} {
    %c0_i32 = arith.constant 0 : i32
    %0 = arith.cmpi eq, %arg2, %c0_i32 : i32
    %1 = arith.extui %0 : i1 to i32
    %c0_i32_0 = arith.constant 0 : i32
    %2 = arith.cmpi ne, %1, %c0_i32_0 : i32
    scf.if %2 {
      %cst_10 = arith.constant 0.000000e+00 : f32
      %12 = vector.broadcast %cst_10 : f32 to vector<128x128xf32>
      %c0_11 = arith.constant 0 : index
      %c0_12 = arith.constant 0 : index
      %13 = vector.load %arg8[%c0_11, %c0_12] : memref<128x128xf32, #tpu.memory_space<vmem>>, vector<128x128xf32>
      tpu.vector_store %arg8[%c0_11, %c0_12], %12 {strides = array<i32>} : memref<128x128xf32, #tpu.memory_space<vmem>>, vector<128x128xf32>,
    } else {
    }
    %c0 = arith.constant 0 : index
    %c0_1 = arith.constant 0 : index
    %3 = vector.load %arg8[%c0, %c0_1] : memref<128x128xf32, #tpu.memory_space<vmem>>, vector<128x128xf32>
    %c0_2 = arith.constant 0 : index
    %c0_3 = arith.constant 0 : index
    %4 = vector.load %arg3[%c0_2, %c0_3] : memref<128x128xbf16, #tpu.memory_space<vmem>>, vector<128x128xbf16>
    %c0_4 = arith.constant 0 : index
    %c0_5 = arith.constant 0 : index
    %5 = vector.load %arg4[%c0_4, %c0_5] : memref<128x128xbf16, #tpu.memory_space<vmem>>, vector<128x128xbf16>
    %cst = arith.constant dense<0.000000e+00> : vector<128x128xf32>
    %6 = tpu.matmul %4, %5, %cst {dimension_numbers = #tpu.dot_dimension_numbers<[1], [0], [0], [1], [0, 0, 1, 1], [], []>} : vector<128x128xbf16>, vector<128x128xbf16>, vector<128x128xf32> -> vector<128x128xf32>
    %7 = arith.addf %3, %6 : vector<128x128xf32>
    %c0_6 = arith.constant 0 : index
    %c0_7 = arith.constant 0 : index
    %8 = vector.load %arg8[%c0_6, %c0_7] : memref<128x128xf32, #tpu.memory_space<vmem>>, vector<128x128xf32>
    tpu.vector_store %arg8[%c0_6, %c0_7], %7 {strides = array<i32>} : memref<128x128xf32, #tpu.memory_space<vmem>>, vector<128x128xf32>,
    %c0_i32_8 = arith.constant 0 : i32
    %9 = arith.cmpi eq, %arg2, %c0_i32_8 : i32
    %10 = arith.extui %9 : i1 to i32
    %c0_i32_9 = arith.constant 0 : i32
    %11 = arith.cmpi ne, %10, %c0_i32_9 : i32
    scf.if %11 {
      %c0_10 = arith.constant 0 : index
      %c0_11 = arith.constant 0 : index
      %12 = vector.load %arg8[%c0_10, %c0_11] : memref<128x128xf32, #tpu.memory_space<vmem>>, vector<128x128xf32>
      %c0_12 = arith.constant 0 : index
      %c0_13 = arith.constant 0 : index
      %13 = vector.load %arg5[%c0_12, %c0_13] : memref<1x128xf32, #tpu.memory_space<vmem>>, vector<1x128xf32>
      %14 = vector.broadcast %13 : vector<1x128xf32> to vector<128x128xf32>
      %15 = arith.mulf %12, %14 : vector<128x128xf32>
      %c0_14 = arith.constant 0 : index
      %c0_15 = arith.constant 0 : index
      %16 = vector.load %arg6[%c0_14, %c0_15] : memref<1x128xf32, #tpu.memory_space<vmem>>, vector<1x128xf32>
      %17 = vector.broadcast %16 : vector<1x128xf32> to vector<128x128xf32>
      %18 = arith.addf %15, %17 : vector<128x128xf32>
      %cst_16 = arith.constant 0.000000e+00 : f32
      %19 = vector.broadcast %cst_16 : f32 to vector<128x128xf32>
      %20 = arith.maximumf %18, %19 : vector<128x128xf32>
      %c0_17 = arith.constant 0 : index
      %c0_18 = arith.constant 0 : index
      %21 = vector.load %arg7[%c0_17, %c0_18] : memref<128x128xf32, #tpu.memory_space<vmem>>, vector<128x128xf32>
      tpu.vector_store %arg7[%c0_17, %c0_18], %20 {strides = array<i32>} : memref<128x128xf32, #tpu.memory_space<vmem>>, vector<128x128xf32>,
    } else {
    }
    return
  }
  func.func @transform_0(%arg0: i32, %arg1: i32, %arg2: i32) -> (i32, i32) {
    %c0_i32 = arith.constant 0 : i32
    return %arg0, %arg2 : i32, i32
  }
  func.func @transform_1(%arg0: i32, %arg1: i32, %arg2: i32) -> (i32, i32) {
    %c0_i32 = arith.constant 0 : i32
    return %arg2, %arg1 : i32, i32
  }
  func.func @transform_2(%arg0: i32, %arg1: i32, %arg2: i32) -> (i32, i32) {
    %c0_i32 = arith.constant 0 : i32
    %c0_i32_0 = arith.constant 0 : i32
    return %c0_i32, %arg1 : i32, i32
  }
  func.func @transform_3(%arg0: i32, %arg1: i32, %arg2: i32) -> (i32, i32) {
    %c0_i32 = arith.constant 0 : i32
    %c0_i32_0 = arith.constant 0 : i32
    return %c0_i32, %arg1 : i32, i32
  }
  func.func @transform_4(%arg0: i32, %arg1: i32, %arg2: i32) -> (i32, i32) {
    %c0_i32 = arith.constant 0 : i32
    return %arg0, %arg1 : i32, i32
  }
}

module attributes {stable_mosaic.version = 11 : i64} {
  func.func @_matmul_bn_relu_kernel(%arg0: i32, %arg1: i32, %arg2: i32, %arg3: memref<128x256xbf16, #tpu.memory_space<vmem>>, %arg4: memref<256x128xbf16, #tpu.memory_space<vmem>>, %arg5: memref<1x128xf32, #tpu.memory_space<vmem>>, %arg6: memref<1x128xf32, #tpu.memory_space<vmem>>, %arg7: memref<128x128xf32, #tpu.memory_space<vmem>>, %arg8: memref<128x128xf32, #tpu.memory_space<vmem>>) attributes {dimension_semantics = [#tpu.dimension_semantics<parallel>, #tpu.dimension_semantics<parallel>, #tpu.dimension_semantics<arbitrary>], iteration_bounds = array<i64: 1, 1, 3>, scalar_prefetch = 0 : i64, scratch_operands = 1 : i64, tpu.core_type = #tpu.core_type<tc>, window_params = [{transform_indices = @transform_0, window_bounds = array<i64: 128, 256>}, {transform_indices = @transform_1, window_bounds = array<i64: 256, 128>}, {transform_indices = @transform_2, window_bounds = array<i64: 1, 128>}, {transform_indices = @transform_3, window_bounds = array<i64: 1, 128>}, {transform_indices = @transform_4, window_bounds = array<i64: 128, 128>}]} {
    %c0_i32 = arith.constant 0 : i32
    %0 = arith.cmpi eq, %arg2, %c0_i32 : i32
    %1 = arith.extui %0 : i1 to i32
    %c0_i32_0 = arith.constant 0 : i32
    %2 = arith.cmpi ne, %1, %c0_i32_0 : i32
    scf.if %2 {
      %cst_9 = arith.constant 0.000000e+00 : f32
      %12 = vector.broadcast %cst_9 : f32 to vector<128x128xf32>
      %c0_10 = arith.constant 0 : index
      %c0_11 = arith.constant 0 : index
      %13 = vector.load %arg8[%c0_10, %c0_11] : memref<128x128xf32, #tpu.memory_space<vmem>>, vector<128x128xf32>
      tpu.vector_store %arg8[%c0_10, %c0_11], %12 {strides = array<i32>} : memref<128x128xf32, #tpu.memory_space<vmem>>, vector<128x128xf32>,
    } else {
    }
    %c0 = arith.constant 0 : index
    %c0_1 = arith.constant 0 : index
    %3 = vector.load %arg8[%c0, %c0_1] : memref<128x128xf32, #tpu.memory_space<vmem>>, vector<128x128xf32>
    %c0_2 = arith.constant 0 : index
    %c0_3 = arith.constant 0 : index
    %4 = vector.load %arg3[%c0_2, %c0_3] : memref<128x256xbf16, #tpu.memory_space<vmem>>, vector<128x256xbf16>
    %c0_4 = arith.constant 0 : index
    %c0_5 = arith.constant 0 : index
    %5 = vector.load %arg4[%c0_4, %c0_5] : memref<256x128xbf16, #tpu.memory_space<vmem>>, vector<256x128xbf16>
    %cst = arith.constant dense<0.000000e+00> : vector<128x128xf32>
    %6 = tpu.matmul %4, %5, %cst {dimension_numbers = #tpu.dot_dimension_numbers<[1], [0], [0], [1], [0, 0, 1, 1], [], []>} : vector<128x256xbf16>, vector<256x128xbf16>, vector<128x128xf32> -> vector<128x128xf32>
    %7 = arith.addf %3, %6 : vector<128x128xf32>
    %c0_6 = arith.constant 0 : index
    %c0_7 = arith.constant 0 : index
    %8 = vector.load %arg8[%c0_6, %c0_7] : memref<128x128xf32, #tpu.memory_space<vmem>>, vector<128x128xf32>
    tpu.vector_store %arg8[%c0_6, %c0_7], %7 {strides = array<i32>} : memref<128x128xf32, #tpu.memory_space<vmem>>, vector<128x128xf32>,
    %c2_i32 = arith.constant 2 : i32
    %9 = arith.cmpi eq, %arg2, %c2_i32 : i32
    %10 = arith.extui %9 : i1 to i32
    %c0_i32_8 = arith.constant 0 : i32
    %11 = arith.cmpi ne, %10, %c0_i32_8 : i32
    scf.if %11 {
      %c0_9 = arith.constant 0 : index
      %c0_10 = arith.constant 0 : index
      %12 = vector.load %arg8[%c0_9, %c0_10] : memref<128x128xf32, #tpu.memory_space<vmem>>, vector<128x128xf32>
      %c0_11 = arith.constant 0 : index
      %c0_12 = arith.constant 0 : index
      %13 = vector.load %arg5[%c0_11, %c0_12] : memref<1x128xf32, #tpu.memory_space<vmem>>, vector<1x128xf32>
      %14 = vector.broadcast %13 : vector<1x128xf32> to vector<128x128xf32>
      %15 = arith.mulf %12, %14 : vector<128x128xf32>
      %c0_13 = arith.constant 0 : index
      %c0_14 = arith.constant 0 : index
      %16 = vector.load %arg6[%c0_13, %c0_14] : memref<1x128xf32, #tpu.memory_space<vmem>>, vector<1x128xf32>
      %17 = vector.broadcast %16 : vector<1x128xf32> to vector<128x128xf32>
      %18 = arith.addf %15, %17 : vector<128x128xf32>
      %cst_15 = arith.constant 0.000000e+00 : f32
      %19 = vector.broadcast %cst_15 : f32 to vector<128x128xf32>
      %20 = arith.maximumf %18, %19 : vector<128x128xf32>
      %c0_16 = arith.constant 0 : index
      %c0_17 = arith.constant 0 : index
      %21 = vector.load %arg7[%c0_16, %c0_17] : memref<128x128xf32, #tpu.memory_space<vmem>>, vector<128x128xf32>
      tpu.vector_store %arg7[%c0_16, %c0_17], %20 {strides = array<i32>} : memref<128x128xf32, #tpu.memory_space<vmem>>, vector<128x128xf32>,
    } else {
    }
    return
  }
  func.func @transform_0(%arg0: i32, %arg1: i32, %arg2: i32) -> (i32, i32) {
    %c0_i32 = arith.constant 0 : i32
    return %arg0, %arg2 : i32, i32
  }
  func.func @transform_1(%arg0: i32, %arg1: i32, %arg2: i32) -> (i32, i32) {
    %c0_i32 = arith.constant 0 : i32
    return %arg2, %arg1 : i32, i32
  }
  func.func @transform_2(%arg0: i32, %arg1: i32, %arg2: i32) -> (i32, i32) {
    %c0_i32 = arith.constant 0 : i32
    %c0_i32_0 = arith.constant 0 : i32
    return %c0_i32, %arg1 : i32, i32
  }
  func.func @transform_3(%arg0: i32, %arg1: i32, %arg2: i32) -> (i32, i32) {
    %c0_i32 = arith.constant 0 : i32
    %c0_i32_0 = arith.constant 0 : i32
    return %c0_i32, %arg1 : i32, i32
  }
  func.func @transform_4(%arg0: i32, %arg1: i32, %arg2: i32) -> (i32, i32) {
    %c0_i32 = arith.constant 0 : i32
    return %arg0, %arg1 : i32, i32
  }
}

</mosaic_0001>

<bundles_post_ra>
// kernel: down_forward.3
= control target key start
LH: loop header
LB: loop body
LE: loop exit
PB: predicated region body
PF: predicated region fallthrough
CT: control target
= control target key end

     0   :  { %vm72_vm0 = vcmask 31744   ;;  %s535_s0 = inlined_call_operand.vmem [shape: f32[4,128,4], index: 0, kind: input, shape index: {}]   ;;  %s536_s1 = inlined_call_operand.vmem [shape: f32[128,4], index: 1, kind: output, shape index: {}]  }
   0x1   :  { %v8_v0 = vld [vmem:[%s535_s0] sm:$0xff]  ;;  %v9_v7 = vld [vmem:[%s535_s0 + $0x8] sm:$0xff]  ;;  %v10_v15 = vld [vmem:[%s535_s0 + $0x10] sm:$0xff] }
   0x2   :  { %v24_v1 = vld [vmem:[%s535_s0 + $0x80] sm:$0xff]  ;;  %v73_v4 = vsel %vm72_vm0, %v8_v0, -inf  ;;  %v25_v8 = vld [vmem:[%s535_s0 + $0x88] sm:$0xff]  ;;  %v80_v13 = vsel %vm72_vm0, %v9_v7, -inf  ;;  %v26_v19 = vld [vmem:[%s535_s0 + $0x90] sm:$0xff]  ;;  %v87_v22 = vsel %vm72_vm0, %v10_v15, -inf }
   0x3   :  { %v40_v2 = vld [vmem:[%s535_s0 + $0x100] sm:$0xff]  ;;  %v74_v5 = vsel %vm72_vm0, %v24_v1, -inf  ;;  %v41_v11 = vld [vmem:[%s535_s0 + $0x108] sm:$0xff]  ;;  %v81_v14 = vsel %vm72_vm0, %v25_v8, -inf  ;;  %v42_v20 = vld [vmem:[%s535_s0 + $0x110] sm:$0xff]  ;;  %v88_v24 = vsel %vm72_vm0, %v26_v19, -inf }
   0x4   :  { %v56_v3 = vld [vmem:[%s535_s0 + $0x180] sm:$0xff]  ;;  %v76_v6 = vsel %vm72_vm0, %v40_v2, -inf  ;;  %v75_v9 = vmax.f32 %v73_v4, %v74_v5  ;;  %v57_v12 = vld [vmem:[%s535_s0 + $0x188] sm:$0xff]  ;;  %v82_v16 = vmax.f32 %v80_v13, %v81_v14  ;;  %v83_v17 = vsel %vm72_vm0, %v41_v11, -inf  ;;  %v58_v21 = vld [vmem:[%s535_s0 + $0x190] sm:$0xff] }
   0x5   :  { %v78_v10 = vsel %vm72_vm0, %v56_v3, -inf  ;;  %v85_v18 = vsel %vm72_vm0, %v57_v12, -inf  ;;  %v90_v25 = vsel %vm72_vm0, %v42_v20, -inf  ;;  %v92_v26 = vsel %vm72_vm0, %v58_v21, -inf  ;;  %v11_v27 = vld [vmem:[%s535_s0 + $0x18] sm:$0xff]  ;;  %v12_v35 = vld [vmem:[%s535_s0 + $0x20] sm:$0xff] }
   0x6   :  { %v77_v23 = vmax.f32 %v75_v9, %v76_v6  ;;  %v27_v28 = vld [vmem:[%s535_s0 + $0x98] sm:$0xff]  ;;  %v84_v30 = vmax.f32 %v82_v16, %v83_v17  ;;  %v89_v31 = vmax.f32 %v87_v22, %v88_v24  ;;  %v94_v33 = vsel %vm72_vm0, %v11_v27, -inf  ;;  %v28_v36 = vld [vmem:[%s535_s0 + $0xa0] sm:$0xff]  ;;  %v13_v43 = vld [vmem:[%s535_s0 + $0x28] sm:$0xff] }
   0x7   :  { %v43_v29 = vld [vmem:[%s535_s0 + $0x118] sm:$0xff]  ;;  %v95_v34 = vsel %vm72_vm0, %v27_v28, -inf  ;;  %v44_v41 = vld [vmem:[%s535_s0 + $0x120] sm:$0xff]  ;;  %v101_v46 = vsel %vm72_vm0, %v12_v35, -inf  ;;  %v102_v47 = vsel %vm72_vm0, %v28_v36, -inf  ;;  %v29_v48 = vld [vmem:[%s535_s0 + $0xa8] sm:$0xff] }
   0x8   :  { %v59_v32 = vld [vmem:[%s535_s0 + $0x198] sm:$0xff]  ;;  %v79_v37 = vmax.f32 %v77_v23, %v78_v10  ;;  %v96_v38 = vmax.f32 %v94_v33, %v95_v34  ;;  %v97_v39 = vsel %vm72_vm0, %v43_v29, -inf  ;;  %v60_v42 = vld [vmem:[%s535_s0 + $0x1a0] sm:$0xff]  ;;  %v86_v44 = vmax.f32 %v84_v30, %v85_v18  ;;  %v45_v49 = vld [vmem:[%s535_s0 + $0x128] sm:$0xff] }
   0x9   :  { %v99_v40 = vsel %vm72_vm0, %v59_v32, -inf  ;;  %v91_v45 = vmax.f32 %v89_v31, %v90_v25  ;;  %v61_v50 = vld [vmem:[%s535_s0 + $0x1a8] sm:$0xff]  ;;  %v103_v52 = vmax.f32 %v101_v46, %v102_v47  ;;  %v104_v53 = vsel %vm72_vm0, %v44_v41, -inf  ;;  %v14_v55 = vld [vmem:[%s535_s0 + $0x30] sm:$0xff]  ;;  %v15_v63 = vld [vmem:[%s535_s0 + $0x38] sm:$0xff] }
   0xa   :  { %185 = vst.msk [vmem:[%s536_s1] sm:$0xff] %vm72_vm0, %v79_v37  ;;  %v98_v51 = vmax.f32 %v96_v38, %v97_v39  ;;  %v106_v54 = vsel %vm72_vm0, %v60_v42, -inf  ;;  %v30_v56 = vld [vmem:[%s535_s0 + $0xb0] sm:$0xff]  ;;  %v108_v59 = vsel %vm72_vm0, %v13_v43, -inf  ;;  %v109_v60 = vsel %vm72_vm0, %v29_v48, -inf  ;;  %v31_v4 = vld [vmem:[%s535_s0 + $0xb8] sm:$0xff] }
   0xb   :  { %v46_v57 = vld [vmem:[%s535_s0 + $0x130] sm:$0xff]  ;;  %186 = vst.msk [vmem:[%s536_s1 + $0x8] sm:$0xff] %vm72_vm0, %v86_v44  ;;  %v93_v58 = vmax.f32 %v91_v45, %v92_v26  ;;  %v111_v61 = vsel %vm72_vm0, %v45_v49, -inf  ;;  %v105_v1 = vmax.f32 %v103_v52, %v104_v53  ;;  %v110_v2 = vmax.f32 %v108_v59, %v109_v60  ;;  %v47_v5 = vld [vmem:[%s535_s0 + $0x138] sm:$0xff]  ;;  %v16_v11 = vld [vmem:[%s535_s0 + $0x40] sm:$0xff] }
   0xc   :  { %v62_v62 = vld [vmem:[%s535_s0 + $0x1b0] sm:$0xff]  ;;  %v100_v0 = vmax.f32 %v98_v51, %v99_v40  ;;  %v113_v3 = vsel %vm72_vm0, %v61_v50, -inf  ;;  %v63_v6 = vld [vmem:[%s535_s0 + $0x1b8] sm:$0xff]  ;;  %v115_v7 = vsel %vm72_vm0, %v14_v55, -inf  ;;  %v116_v8 = vsel %vm72_vm0, %v30_v56, -inf  ;;  %v32_v16 = vld [vmem:[%s535_s0 + $0xc0] sm:$0xff] }
   0xd   :  { %187 = vst.msk [vmem:[%s536_s1 + $0x10] sm:$0xff] %vm72_vm0, %v93_v58  ;;  %v118_v9 = vsel %vm72_vm0, %v46_v57, -inf  ;;  %v120_v10 = vsel %vm72_vm0, %v62_v62, -inf  ;;  %v107_v12 = vmax.f32 %v105_v1, %v106_v54  ;;  %v112_v13 = vmax.f32 %v110_v2, %v111_v61  ;;  %v48_v17 = vld [vmem:[%s535_s0 + $0x140] sm:$0xff]  ;;  %v17_v23 = vld [vmem:[%s535_s0 + $0x48] sm:$0xff]  ;;  %v18_v31 = vld [vmem:[%s535_s0 + $0x50] sm:$0xff] }
   0xe   :  { %188 = vst.msk [vmem:[%s536_s1 + $0x18] sm:$0xff] %vm72_vm0, %v100_v0  ;;  %v117_v14 = vmax.f32 %v115_v7, %v116_v8  ;;  %v122_v15 = vsel %vm72_vm0, %v15_v63, -inf  ;;  %v64_v18 = vld [vmem:[%s535_s0 + $0x1c0] sm:$0xff]  ;;  %v123_v19 = vsel %vm72_vm0, %v31_v4, -inf  ;;  %v125_v20 = vsel %vm72_vm0, %v47_v5, -inf  ;;  %v33_v24 = vld [vmem:[%s535_s0 + $0xc8] sm:$0xff] }
   0xf   :  { %v127_v21 = vsel %vm72_vm0, %v63_v6, -inf  ;;  %v129_v22 = vsel %vm72_vm0, %v16_v11, -inf  ;;  %189 = vst.msk [vmem:[%s536_s1 + $0x20] sm:$0xff] %vm72_vm0, %v107_v12  ;;  %v114_v25 = vmax.f32 %v112_v13, %v113_v3  ;;  %v124_v27 = vmax.f32 %v122_v15, %v123_v19  ;;  %v49_v29 = vld [vmem:[%s535_s0 + $0x148] sm:$0xff]  ;;  %v34_v36 = vld [vmem:[%s535_s0 + $0xd0] sm:$0xff]  ;;  %v19_v43 = vld [vmem:[%s535_s0 + $0x58] sm:$0xff] }
  0x10   :  { %v119_v26 = vmax.f32 %v117_v14, %v118_v9  ;;  %v130_v28 = vsel %vm72_vm0, %v32_v16, -inf  ;;  %v65_v30 = vld [vmem:[%s535_s0 + $0x1c8] sm:$0xff]  ;;  %v132_v33 = vsel %vm72_vm0, %v48_v17, -inf  ;;  %v134_v34 = vsel %vm72_vm0, %v64_v18, -inf  ;;  %v50_v37 = vld [vmem:[%s535_s0 + $0x150] sm:$0xff]  ;;  %v35_v44 = vld [vmem:[%s535_s0 + $0xd8] sm:$0xff] }
  0x11   :  { %v131_v32 = vmax.f32 %v129_v22, %v130_v28  ;;  %v136_v35 = vsel %vm72_vm0, %v17_v23, -inf  ;;  %v66_v38 = vld [vmem:[%s535_s0 + $0x1d0] sm:$0xff]  ;;  %190 = vst.msk [vmem:[%s536_s1 + $0x28] sm:$0xff] %vm72_vm0, %v114_v25  ;;  %v126_v40 = vmax.f32 %v124_v27, %v125_v20  ;;  %v137_v41 = vsel %vm72_vm0, %v33_v24, -inf  ;;  %v51_v49 = vld [vmem:[%s535_s0 + $0x158] sm:$0xff]  ;;  %v20_v51 = vld [vmem:[%s535_s0 + $0x60] sm:$0xff] }
  0x12   :  { %v121_v39 = vmax.f32 %v119_v26, %v120_v10  ;;  %v139_v42 = vsel %vm72_vm0, %v49_v29, -inf  ;;  %v138_v46 = vmax.f32 %v136_v35, %v137_v41  ;;  %v141_v47 = vsel %vm72_vm0, %v65_v30, -inf  ;;  %v67_v50 = vld [vmem:[%s535_s0 + $0x1d8] sm:$0xff]  ;;  %v36_v56 = vld [vmem:[%s535_s0 + $0xe0] sm:$0xff]  ;;  %v21_v63 = vld [vmem:[%s535_s0 + $0x68] sm:$0xff] }
  0x13   :  { %v133_v45 = vmax.f32 %v131_v32, %v132_v33  ;;  %v143_v48 = vsel %vm72_vm0, %v18_v31, -inf  ;;  %v128_v52 = vmax.f32 %v126_v40, %v127_v21  ;;  %v144_v53 = vsel %vm72_vm0, %v34_v36, -inf  ;;  %v52_v57 = vld [vmem:[%s535_s0 + $0x160] sm:$0xff]  ;;  %v37_v0 = vld [vmem:[%s535_s0 + $0xe8] sm:$0xff]  ;;  %v22_v10 = vld [vmem:[%s535_s0 + $0x70] sm:$0xff] }
  0x14   :  { %191 = vst.msk [vmem:[%s536_s1 + $0x30] sm:$0xff] %vm72_vm0, %v121_v39  ;;  %v146_v54 = vsel %vm72_vm0, %v50_v37, -inf  ;;  %v148_v55 = vsel %vm72_vm0, %v66_v38, -inf  ;;  %v140_v59 = vmax.f32 %v138_v46, %v139_v42  ;;  %v145_v60 = vmax.f32 %v143_v48, %v144_v53  ;;  %v68_v62 = vld [vmem:[%s535_s0 + $0x1e0] sm:$0xff]  ;;  %v53_v5 = vld [vmem:[%s535_s0 + $0x168] sm:$0xff]  ;;  %v38_v16 = vld [vmem:[%s535_s0 + $0xf0] sm:$0xff] }
  0x15   :  { %v135_v58 = vmax.f32 %v133_v45, %v134_v34  ;;  %v150_v61 = vsel %vm72_vm0, %v19_v43, -inf  ;;  %192 = vst.msk [vmem:[%s536_s1 + $0x38] sm:$0xff] %vm72_vm0, %v128_v52  ;;  %v151_v1 = vsel %vm72_vm0, %v35_v44, -inf  ;;  %v153_v2 = vsel %vm72_vm0, %v51_v49, -inf  ;;  %v69_v14 = vld [vmem:[%s535_s0 + $0x1e8] sm:$0xff]  ;;  %v54_v17 = vld [vmem:[%s535_s0 + $0x170] sm:$0xff] }
  0x16   :  { %v155_v3 = vsel %vm72_vm0, %v67_v50, -inf  ;;  %v157_v4 = vsel %vm72_vm0, %v20_v51, -inf  ;;  %v142_v6 = vmax.f32 %v140_v59, %v141_v47  ;;  %v147_v7 = vmax.f32 %v145_v60, %v146_v54  ;;  %v23_v22 = vld [vmem:[%s535_s0 + $0x78] sm:$0xff]  ;;  %v70_v25 = vld [vmem:[%s535_s0 + $0x1f0] sm:$0xff] }
  0x17   :  { %193 = vst.msk [vmem:[%s536_s1 + $0x40] sm:$0xff] %vm72_vm0, %v135_v58  ;;  %v152_v8 = vmax.f32 %v150_v61, %v151_v1  ;;  %v158_v9 = vsel %vm72_vm0, %v36_v56, -inf  ;;  %v160_v12 = vsel %vm72_vm0, %v52_v57, -inf  ;;  %v162_v13 = vsel %vm72_vm0, %v68_v62, -inf  ;;  %v39_v27 = vld [vmem:[%s535_s0 + $0xf8] sm:$0xff] }
  0x18   :  { %v159_v11 = vmax.f32 %v157_v4, %v158_v9  ;;  %v164_v15 = vsel %vm72_vm0, %v21_v63, -inf  ;;  %194 = vst.msk [vmem:[%s536_s1 + $0x48] sm:$0xff] %vm72_vm0, %v142_v6  ;;  %v149_v18 = vmax.f32 %v147_v7, %v148_v55  ;;  %v165_v20 = vsel %vm72_vm0, %v37_v0, -inf  ;;  %v55_v28 = vld [vmem:[%s535_s0 + $0x178] sm:$0xff] }
  0x19   :  { %v154_v19 = vmax.f32 %v152_v8, %v153_v2  ;;  %v167_v21 = vsel %vm72_vm0, %v53_v5, -inf  ;;  %v166_v24 = vmax.f32 %v164_v15, %v165_v20  ;;  %v171_v26 = vsel %vm72_vm0, %v22_v10, -inf  ;;  %v71_v36 = vld [vmem:[%s535_s0 + $0x1f8] sm:$0xff] }
  0x1a   :  { %v161_v23 = vmax.f32 %v159_v11, %v160_v12  ;;  %195 = vst.msk [vmem:[%s536_s1 + $0x50] sm:$0xff] %vm72_vm0, %v149_v18  ;;  %v169_v30 = vsel %vm72_vm0, %v69_v14, -inf  ;;  %v172_v31 = vsel %vm72_vm0, %v38_v16, -inf  ;;  %v174_v32 = vsel %vm72_vm0, %v54_v17, -inf }
  0x1b   :  { %v156_v29 = vmax.f32 %v154_v19, %v155_v3  ;;  %v168_v34 = vmax.f32 %v166_v24, %v167_v21  ;;  %v173_v35 = vmax.f32 %v171_v26, %v172_v31  ;;  %v178_v37 = vsel %vm72_vm0, %v23_v22, -inf }
  0x1c   :  { %v163_v33 = vmax.f32 %v161_v23, %v162_v13  ;;  %v176_v38 = vsel %vm72_vm0, %v70_v25, -inf  ;;  %v179_v39 = vsel %vm72_vm0, %v39_v27, -inf  ;;  %v181_v40 = vsel %vm72_vm0, %v55_v28, -inf }
  0x1d   :  { %196 = vst.msk [vmem:[%s536_s1 + $0x58] sm:$0xff] %vm72_vm0, %v156_v29  ;;  %v170_v41 = vmax.f32 %v168_v34, %v169_v30  ;;  %v175_v42 = vmax.f32 %v173_v35, %v174_v32  ;;  %v180_v43 = vmax.f32 %v178_v37, %v179_v39  ;;  %v183_v44 = vsel %vm72_vm0, %v71_v36, -inf }
  0x1e   :  { %197 = vst.msk [vmem:[%s536_s1 + $0x60] sm:$0xff] %vm72_vm0, %v163_v33 }
  0x1f   :  { %198 = vst.msk [vmem:[%s536_s1 + $0x68] sm:$0xff] %vm72_vm0, %v170_v41  ;;  %v177_v45 = vmax.f32 %v175_v42, %v176_v38  ;;  %v182_v46 = vmax.f32 %v180_v43, %v181_v40 }
  0x21   :  { %199 = vst.msk [vmem:[%s536_s1 + $0x70] sm:$0xff] %vm72_vm0, %v177_v45  ;;  %v184_v47 = vmax.f32 %v182_v46, %v183_v44 }
  0x23   :  { %200 = vst.msk [vmem:[%s536_s1 + $0x78] sm:$0xff] %vm72_vm0, %v184_v47 }

// kernel: down_forward.4
= control target key start
LH: loop header
LB: loop body
LE: loop exit
PB: predicated region body
PF: predicated region fallthrough
CT: control target
= control target key end

     0   :  { %s626_s1 = inlined_call_operand.vmem [shape: bf16[128,128], index: 1, kind: input, shape index: {}]   ;;  %s627_s2 = inlined_call_operand.vmem [shape: f32[1,128], index: 2, kind: input, shape index: {}]   ;;  %s628_s3 = inlined_call_operand.vmem [shape: f32[1,128], index: 3, kind: input, shape index: {}]   ;;  %s629_s0 = inlined_call_operand.vmem [shape: bf16[128,128], index: 0, kind: input, shape index: {}]   ;;  %s630_s4 = inlined_call_operand.vmem [shape: f32[128,128], index: 4, kind: output, shape index: {}]  }
   0x1   :  { %v436_v0 = vld [vmem:[%s626_s1 + $0x38] sm:$0xff]  ;;  %v435_v1 = vld [vmem:[%s626_s1 + $0x30] sm:$0xff]  ;;  %v434_v2 = vld [vmem:[%s626_s1 + $0x28] sm:$0xff] }
   0x2   :  { %181 = vmatpush.bf16.msra.mxu0 %v436_v0  ;;  %437 = vmatpush.bf16.msra.mxu1 %v436_v0  ;;  %v433_v3 = vld [vmem:[%s626_s1 + $0x20] sm:$0xff]  ;;  %v432_v4 = vld [vmem:[%s626_s1 + $0x18] sm:$0xff]  ;;  %v431_v5 = vld [vmem:[%s626_s1 + $0x10] sm:$0xff] }
   0x3   :  { %438 = vmatpush.bf16.msra.mxu2 %v436_v0  ;;  %439 = vmatpush.bf16.msra.mxu3 %v436_v0  ;;  %v430_v6 = vld [vmem:[%s626_s1 + $0x8] sm:$0xff]  ;;  %v429_v7 = vld [vmem:[%s626_s1] sm:$0xff]  ;;  %v423_v9 = vld [vmem:[%s629_s0 + $0x10] sm:$0xff] }
   0x4   :  { %v421_v8 = vld [vmem:[%s629_s0] sm:$0xff]  ;;  %v427_v11 = vld [vmem:[%s629_s0 + $0x30] sm:$0xff]  ;;  %v422_v12 = vld [vmem:[%s629_s0 + $0x8] sm:$0xff] }
   0x5   :  { %v425_v10 = vld [vmem:[%s629_s0 + $0x20] sm:$0xff]  ;;  %v424_v13 = vld [vmem:[%s629_s0 + $0x18] sm:$0xff]  ;;  %v426_v14 = vld [vmem:[%s629_s0 + $0x28] sm:$0xff] }
   0x6   :  { %182 = vmatpush.bf16.msra.mxu0 %v435_v1  ;;  %440 = vmatpush.bf16.msra.mxu1 %v435_v1  ;;  %v428_v15 = vld [vmem:[%s629_s0 + $0x38] sm:$0xff]  ;;  %v539_v16 = vld [vmem:[%s627_s2] ss:$0 sm:$0xff] }
   0x7   :  { %441 = vmatpush.bf16.msra.mxu2 %v435_v1  ;;  %442 = vmatpush.bf16.msra.mxu3 %v435_v1  ;;  %v544_v17 = vld [vmem:[%s628_s3] ss:$0 sm:$0xff] }
   0xa   :  { %183 = vmatpush.bf16.msra.mxu0 %v434_v2  ;;  %443 = vmatpush.bf16.msra.mxu1 %v434_v2 }
   0xb   :  { %444 = vmatpush.bf16.msra.mxu2 %v434_v2  ;;  %445 = vmatpush.bf16.msra.mxu3 %v434_v2 }
   0xe   :  { %184 = vmatpush.bf16.msra.mxu0 %v433_v3  ;;  %446 = vmatpush.bf16.msra.mxu1 %v433_v3 }
   0xf   :  { %447 = vmatpush.bf16.msra.mxu2 %v433_v3  ;;  %448 = vmatpush.bf16.msra.mxu3 %v433_v3 }
  0x12   :  { %185 = vmatpush.bf16.msra.mxu0 %v432_v4  ;;  %449 = vmatpush.bf16.msra.mxu1 %v432_v4 }
  0x13   :  { %450 = vmatpush.bf16.msra.mxu2 %v432_v4  ;;  %451 = vmatpush.bf16.msra.mxu3 %v432_v4 }
  0x16   :  { %186 = vmatpush.bf16.msra.mxu0 %v431_v5  ;;  %452 = vmatpush.bf16.msra.mxu1 %v431_v5 }
  0x17   :  { %453 = vmatpush.bf16.msra.mxu2 %v431_v5  ;;  %454 = vmatpush.bf16.msra.mxu3 %v431_v5 }
  0x1a   :  { %187 = vmatpush.bf16.msra.mxu0 %v430_v6  ;;  %455 = vmatpush.bf16.msra.mxu1 %v430_v6 }
  0x1b   :  { %456 = vmatpush.bf16.msra.mxu2 %v430_v6  ;;  %457 = vmatpush.bf16.msra.mxu3 %v430_v6 }
  0x1e   :  { %188 = vmatpush.bf16.msra.mxu0 %v429_v7  ;;  %458 = vmatpush.bf16.msra.mxu1 %v429_v7 }
  0x1f   :  { %459 = vmatpush.bf16.msra.mxu2 %v429_v7  ;;  %460 = vmatpush.bf16.msra.mxu3 %v429_v7 }
  0x21   :  { %189 = vmatmul.bf16.vlgmr.msra.gmra.mxu0 %v421_v8  ;;  %199 = vmatmul.bf16.vlgmr.msra.gmra.mxu1 %v423_v9 }
  0x22   :  { %209 = vmatmul.bf16.vlgmr.msra.gmra.mxu2 %v425_v10  ;;  %219 = vmatmul.bf16.vlgmr.msra.gmra.mxu3 %v427_v11 }
  0x31   :  { %194 = vmatmul.bf16.gmra.mxu0 %v422_v12  ;;  %204 = vmatmul.bf16.gmra.mxu1 %v424_v13 }
  0x32   :  { %214 = vmatmul.bf16.gmra.mxu2 %v426_v14  ;;  %224 = vmatmul.bf16.gmra.mxu3 %v428_v15 }
  0x9e   :  { %v190_v18 = vpop.f32.mrf.mxu0  ;;  %v200_v19 = vpop.f32.mrf.mxu1 }
  0x9f   :  { %v285_v20 = vmul.f32 %v539_v16, %v190_v18  ;;  %v289_v21 = vmul.f32 %v539_v16, %v200_v19 }
  0xa1   :  { %v305_v22 = vadd.f32 %v544_v17, %v285_v20  ;;  %v309_v23 = vadd.f32 %v544_v17, %v289_v21 }
  0xa3   :  { %v321_v24 = vmax.f32 %v305_v22, 0.0  ;;  %v325_v25 = vmax.f32 %v309_v23, 0.0 }
  0xa5   :  { %337 = vst [vmem:[%s630_s4] sm:$0xff] %v321_v24  ;;  %v210_v26 = vpop.f32.mrf.mxu2  ;;  %v220_v27 = vpop.f32.mrf.mxu3 }
  0xa6   :  { %341 = vst [vmem:[%s630_s4 + $0x20] sm:$0xff] %v325_v25  ;;  %v293_v28 = vmul.f32 %v539_v16, %v210_v26  ;;  %v297_v29 = vmul.f32 %v539_v16, %v220_v27  ;;  %v192_v30 = vpop.f32.mrf.mxu0  ;;  %v202_v31 = vpop.f32.mrf.mxu1 }
  0xa7   :  { %v286_v32 = vmul.f32 %v539_v16, %v192_v30  ;;  %v290_v33 = vmul.f32 %v539_v16, %v202_v31 }
  0xa8   :  { %v313_v34 = vadd.f32 %v544_v17, %v293_v28  ;;  %v317_v35 = vadd.f32 %v544_v17, %v297_v29 }
  0xa9   :  { %v306_v36 = vadd.f32 %v544_v17, %v286_v32  ;;  %v310_v37 = vadd.f32 %v544_v17, %v290_v33 }
  0xaa   :  { %v329_v38 = vmax.f32 %v313_v34, 0.0  ;;  %v333_v39 = vmax.f32 %v317_v35, 0.0 }
  0xab   :  { %v322_v40 = vmax.f32 %v306_v36, 0.0  ;;  %v326_v41 = vmax.f32 %v310_v37, 0.0 }
  0xac   :  { %345 = vst [vmem:[%s630_s4 + $0x40] sm:$0xff] %v329_v38 }
  0xad   :  { %349 = vst [vmem:[%s630_s4 + $0x60] sm:$0xff] %v333_v39  ;;  %v212_v42 = vpop.f32.mrf.mxu2  ;;  %v222_v43 = vpop.f32.mrf.mxu3 }
  0xae   :  { %338 = vst [vmem:[%s630_s4 + $0x8] sm:$0xff] %v322_v40  ;;  %v294_v44 = vmul.f32 %v539_v16, %v212_v42  ;;  %v298_v45 = vmul.f32 %v539_v16, %v222_v43  ;;  %v195_v46 = vpop.f32.mrf.mxu0  ;;  %v205_v47 = vpop.f32.mrf.mxu1 }
  0xaf   :  { %342 = vst [vmem:[%s630_s4 + $0x28] sm:$0xff] %v326_v41  ;;  %v287_v48 = vmul.f32 %v539_v16, %v195_v46  ;;  %v291_v49 = vmul.f32 %v539_v16, %v205_v47 }
  0xb0   :  { %v314_v50 = vadd.f32 %v544_v17, %v294_v44  ;;  %v318_v51 = vadd.f32 %v544_v17, %v298_v45 }
  0xb1   :  { %v307_v52 = vadd.f32 %v544_v17, %v287_v48  ;;  %v311_v53 = vadd.f32 %v544_v17, %v291_v49 }
  0xb2   :  { %v330_v54 = vmax.f32 %v314_v50, 0.0  ;;  %v334_v55 = vmax.f32 %v318_v51, 0.0 }
  0xb3   :  { %v323_v56 = vmax.f32 %v307_v52, 0.0  ;;  %v327_v57 = vmax.f32 %v311_v53, 0.0 }
  0xb4   :  { %346 = vst [vmem:[%s630_s4 + $0x48] sm:$0xff] %v330_v54 }
  0xb5   :  { %350 = vst [vmem:[%s630_s4 + $0x68] sm:$0xff] %v334_v55  ;;  %v215_v58 = vpop.f32.mrf.mxu2  ;;  %v225_v59 = vpop.f32.mrf.mxu3 }
  0xb6   :  { %339 = vst [vmem:[%s630_s4 + $0x10] sm:$0xff] %v323_v56  ;;  %v295_v60 = vmul.f32 %v539_v16, %v215_v58  ;;  %v299_v61 = vmul.f32 %v539_v16, %v225_v59  ;;  %v197_v62 = vpop.f32.mrf.mxu0  ;;  %v207_v63 = vpop.f32.mrf.mxu1 }
  0xb7   :  { %343 = vst [vmem:[%s630_s4 + $0x30] sm:$0xff] %v327_v57  ;;  %v288_v0 = vmul.f32 %v539_v16, %v197_v62  ;;  %v292_v1 = vmul.f32 %v539_v16, %v207_v63 }
  0xb8   :  { %v315_v2 = vadd.f32 %v544_v17, %v295_v60  ;;  %v319_v3 = vadd.f32 %v544_v17, %v299_v61 }
  0xb9   :  { %v308_v4 = vadd.f32 %v544_v17, %v288_v0  ;;  %v312_v5 = vadd.f32 %v544_v17, %v292_v1 }
  0xba   :  { %v331_v6 = vmax.f32 %v315_v2, 0.0  ;;  %v335_v7 = vmax.f32 %v319_v3, 0.0 }
  0xbb   :  { %v324_v8 = vmax.f32 %v308_v4, 0.0  ;;  %v328_v9 = vmax.f32 %v312_v5, 0.0 }
  0xbc   :  { %347 = vst [vmem:[%s630_s4 + $0x50] sm:$0xff] %v331_v6 }
  0xbd   :  { %351 = vst [vmem:[%s630_s4 + $0x70] sm:$0xff] %v335_v7  ;;  %v217_v10 = vpop.f32.mrf.mxu2  ;;  %v227_v11 = vpop.f32.mrf.mxu3 }
  0xbe   :  { %340 = vst [vmem:[%s630_s4 + $0x18] sm:$0xff] %v324_v8  ;;  %v296_v12 = vmul.f32 %v539_v16, %v217_v10  ;;  %v300_v13 = vmul.f32 %v539_v16, %v227_v11 }
  0xbf   :  { %344 = vst [vmem:[%s630_s4 + $0x38] sm:$0xff] %v328_v9 }
  0xc0   :  { %v316_v14 = vadd.f32 %v544_v17, %v296_v12  ;;  %v320_v15 = vadd.f32 %v544_v17, %v300_v13 }
  0xc2   :  { %v332_v18 = vmax.f32 %v316_v14, 0.0  ;;  %v336_v19 = vmax.f32 %v320_v15, 0.0 }
  0xc4   :  { %348 = vst [vmem:[%s630_s4 + $0x58] sm:$0xff] %v332_v18 }
  0xc5   :  { %352 = vst [vmem:[%s630_s4 + $0x78] sm:$0xff] %v336_v19 }

// kernel: down_forward.5
= control target key start
LH: loop header
LB: loop body
LE: loop exit
PB: predicated region body
PF: predicated region fallthrough
CT: control target
= control target key end

     0   :  { %9 = vsyncpa [#allocation5], 0  ;;  %s1323_s15 = smov 0   ;;  %s1325_s16 = smov 0   ;;  %s1490_s0 = inlined_call_operand.vmem [shape: bf16[128,768], index: 0, kind: input, shape index: {}]   ;;  %s1491_s1 = inlined_call_operand.vmem [shape: bf16[768,128], index: 1, kind: input, shape index: {}]   ;;  %s1492_s2 = inlined_call_operand.vmem [shape: f32[1,128], index: 2, kind: input, shape index: {}]   ;;  %s1493_s3 = inlined_call_operand.vmem [shape: f32[1,128], index: 3, kind: input, shape index: {}]   ;;  %s1494_s4 = inlined_call_operand.hbm [shape: f32[128,128], index: 4, kind: output, shape index: {}]  }
   0x1   :  { %s1327_s17 = smov 0   ;;  %s1329_s18 = smov 0  }
   0x2   :  { %s1331_s19 = smov 0  }
   0x3 LB: > { %s975_s20 = sadd.s32 4294967295, %s1292_s19   ;;  %s27_s21 = sadd.s32 1, %s1288_s18  ;;  %s1292_s19 = sphi %s1331_s19, %s15_s19   ;;  %s1288_s18 = sphi %s1329_s18, %s1498_s18   ;;  %s1284_s17 = sphi %s1327_s17, %s1497_s17   ;;  %s1280_s16 = sphi %s1325_s16, %s1496_s16   ;;  %s1276_s15 = sphi %s1323_s15, %s1495_s15  }
   0x4   : > { %p28_p0 = scmp.ge.s32.totalorder %s27_s21, 3  ;;  %p50_p1 = scmp.ne.s32.totalorder %s1280_s16, %s1276_s15 }
   0x5   : > { %p51_p2 = scmp.eq.s32.totalorder %s1292_s19, 0  ;;  %s43_s23 = sadd.s32 1, %s1280_s16 }
   0x6   : > { %s1500_s21 = smov (%p28_p0, %s27_s21), 0  ;;  %p979_p5 = scmp.ge.s32.totalorder %s1292_s19, 3 }
   0x7   : > { %p52_p3 = por %p51_p2, %p50_p1  ;;  %s39_s22 = ssub.s32 %s1288_s18, %s1500_s21 }
   0x8   : > { %p41_p4 = scmp.eq.s32.totalorder %s39_s22, 0  ;;  %196 = sbr.rel (%p979_p5) target bundleno = 33 (0x21), region = 24 }
   0xa   : > { %s1359_s24 = scalar_select %p41_p4, %s1280_s16, %s43_s23  }
   0xd   : > { %199 = sbr.rel (!%p52_p3) target bundleno = 33 (0x21), region = 28  ;;  %s201_s25 = sand.u32 (%p52_p3), 1, %s1280_s16  }
   0xe   : > { %s1121_s26 = sshll.u32 (%p52_p3), %s1288_s18, 3  ;;  %s980_s27 = sshll.u32 (%p52_p3), %s201_s25, 7 }
   0xf   : > { %s1367_s30 = scalar_lea.vmem (%p52_p3), %s1490_s0, %s1121_s26  ;;  %s203_s5 = scalar_lea.vmem (%p52_p3), [#allocation3], %s980_s27 }
  0x10   : > { %v268_v0 = vld [vmem:[%s1367_s30] sm:$0xff] (%p52_p3)  ;;  %v270_v1 = vld [vmem:[%s1367_s30 + $0x18] sm:$0xff] (%p52_p3)  ;;  %v272_v2 = vld [vmem:[%s1367_s30 + $0x30] sm:$0xff] (%p52_p3) }
  0x11   : > { %269 = vst [vmem:[%s203_s5] sm:$0xff] (%p52_p3), %v268_v0  ;;  %v274_v3 = vld [vmem:[%s1367_s30 + $0x48] sm:$0xff] (%p52_p3)  ;;  %v276_v4 = vld [vmem:[%s1367_s30 + $0x60] sm:$0xff] (%p52_p3)  ;;  %v278_v5 = vld [vmem:[%s1367_s30 + $0x78] sm:$0xff] (%p52_p3) }
  0x12   : > { %271 = vst [vmem:[%s203_s5 + $0x8] sm:$0xff] %v270_v1  ;;  %v280_v6 = vld [vmem:[%s1367_s30 + $0x90] sm:$0xff]  ;;  %v282_v7 = vld [vmem:[%s1367_s30 + $0xa8] sm:$0xff]  ;;  %v284_v8 = vld [vmem:[%s1367_s30 + $0xc0] sm:$0xff] }
  0x13   : > { %273 = vst [vmem:[%s203_s5 + $0x10] sm:$0xff] %v272_v2  ;;  %v286_v9 = vld [vmem:[%s1367_s30 + $0xd8] sm:$0xff]  ;;  %v288_v10 = vld [vmem:[%s1367_s30 + $0xf0] sm:$0xff]  ;;  %v290_v11 = vld [vmem:[%s1367_s30 + $0x108] sm:$0xff] }
  0x14   : > { %275 = vst [vmem:[%s203_s5 + $0x18] sm:$0xff] %v274_v3  ;;  %v292_v12 = vld [vmem:[%s1367_s30 + $0x120] sm:$0xff]  ;;  %v294_v13 = vld [vmem:[%s1367_s30 + $0x138] sm:$0xff]  ;;  %v296_v14 = vld [vmem:[%s1367_s30 + $0x150] sm:$0xff] }
  0x15   : > { %277 = vst [vmem:[%s203_s5 + $0x20] sm:$0xff] %v276_v4  ;;  %v298_v15 = vld [vmem:[%s1367_s30 + $0x168] sm:$0xff] }
  0x16   : > { %279 = vst [vmem:[%s203_s5 + $0x28] sm:$0xff] %v278_v5 }
  0x17   : > { %281 = vst [vmem:[%s203_s5 + $0x30] sm:$0xff] %v280_v6 }
  0x18   : > { %283 = vst [vmem:[%s203_s5 + $0x38] sm:$0xff] %v282_v7 }
  0x19   : > { %285 = vst [vmem:[%s203_s5 + $0x40] sm:$0xff] %v284_v8 }
  0x1a   : > { %287 = vst [vmem:[%s203_s5 + $0x48] sm:$0xff] %v286_v9 }
  0x1b   : > { %289 = vst [vmem:[%s203_s5 + $0x50] sm:$0xff] %v288_v10 }
  0x1c   : > { %291 = vst [vmem:[%s203_s5 + $0x58] sm:$0xff] %v290_v11 }
  0x1d   : > { %293 = vst [vmem:[%s203_s5 + $0x60] sm:$0xff] %v292_v12 }
  0x1e   : > { %295 = vst [vmem:[%s203_s5 + $0x68] sm:$0xff] %v294_v13 }
  0x1f   : > { %297 = vst [vmem:[%s203_s5 + $0x70] sm:$0xff] %v296_v14 }
  0x20   : > { %299 = vst [vmem:[%s203_s5 + $0x78] sm:$0xff] %v298_v15 }
  0x21 PF: > { %p983_p6 = scmp.ge.s32.totalorder %s1292_s19, 1  ;;  %p316_p7 = scmp.lt.s32.totalorder %s1292_s19, 4 }
  0x23   : > { %p317_p8 = pnand %p983_p6, %p316_p7 }
  0x24   : > { %s323_s6 = sand.u32 (!%p317_p8), 1, %s1276_s15   ;;  %s985_s7 = sshll.u32 (!%p317_p8), %s1284_s17, 5 }
  0x25   : > { %320 = sbr.rel (%p317_p8) target bundleno = 319 (0x13f), region = 70  ;;  %s984_s8 = sshll.u32 (!%p317_p8), %s323_s6, 7 }
  0x26   : > { %p360_p9 = scmp.lt.s32.totalorder (!%p317_p8), %s985_s7, 95  ;;  %s1394_s13 = scalar_lea.vmem (!%p317_p8), [#allocation3], %s984_s8 }
  0x27   : > { %p987_p10 = scmp.ne.s32.totalorder (!%p317_p8), %s1284_s17, 0 }
  0x2a   : > { %s1502_s7 = smov (!%p360_p9, %s985_s7), 95  ;;  %378 = sbr.rel (%p987_p10) target bundleno = 64 (0x40), region = 78 }
  0x2b   : > { %s986_s9 = sshll.u32 %s1502_s7, 2 }
  0x2c   : > { %s1392_s12 = scalar_lea.vmem %s1491_s1, %s986_s9 }
  0x2f   : > { %v1294_v16 = vmov 0.0  }
  0x30   : > { %379 = vst [vmem:[#allocation2 + $0x30] sm:$0xff] %v1294_v16 }
  0x31   : > { %380 = vst [vmem:[#allocation2] sm:$0xff] %v1294_v16 }
  0x32   : > { %381 = vst [vmem:[#allocation2 + $0x58] sm:$0xff] %v1294_v16 }
  0x33   : > { %382 = vst [vmem:[#allocation2 + $0x18] sm:$0xff] %v1294_v16 }
  0x34   : > { %383 = vst [vmem:[#allocation2 + $0x50] sm:$0xff] %v1294_v16 }
  0x35   : > { %384 = vst [vmem:[#allocation2 + $0x68] sm:$0xff] %v1294_v16 }
  0x36   : > { %385 = vst [vmem:[#allocation2 + $0x8] sm:$0xff] %v1294_v16 }
  0x37   : > { %386 = vst [vmem:[#allocation2 + $0x48] sm:$0xff] %v1294_v16 }
  0x38   : > { %387 = vst [vmem:[#allocation2 + $0x40] sm:$0xff] %v1294_v16 }
  0x39   : > { %388 = vst [vmem:[#allocation2 + $0x20] sm:$0xff] %v1294_v16 }
  0x3a   : > { %389 = vst [vmem:[#allocation2 + $0x10] sm:$0xff] %v1294_v16 }
  0x3b   : > { %390 = vst [vmem:[#allocation2 + $0x38] sm:$0xff] %v1294_v16 }
  0x3c   : > { %391 = vst [vmem:[#allocation2 + $0x60] sm:$0xff] %v1294_v16 }
  0x3d   : > { %392 = vst [vmem:[#allocation2 + $0x70] sm:$0xff] %v1294_v16 }
  0x3e   : > { %393 = vst [vmem:[#allocation2 + $0x78] sm:$0xff] %v1294_v16 }
  0x3f   : > { %394 = vst [vmem:[#allocation2 + $0x28] sm:$0xff] %v1294_v16 }
  0x40 PF: > { %v1145_v17 = vld [vmem:[%s1392_s12 + $0x38] sm:$0xff]  ;;  %v1144_v19 = vld [vmem:[%s1392_s12 + $0x30] sm:$0xff]  ;;  %v1143_v21 = vld [vmem:[%s1392_s12 + $0x28] sm:$0xff]  ;;  %p1116_p11 = scmp.ne.s32.totalorder %s1284_s17, 2 }
  0x41   : > { %v1153_v18 = vld [vmem:[%s1392_s12 + $0x78] sm:$0xff]  ;;  %635 = vmatpush.bf16.msra.mxu0 %v1145_v17  ;;  %1154 = vmatpush.bf16.msra.mxu2 %v1145_v17  ;;  %v1152_v20 = vld [vmem:[%s1392_s12 + $0x70] sm:$0xff]  ;;  %v1151_v22 = vld [vmem:[%s1392_s12 + $0x68] sm:$0xff] }
  0x42   : > { %684 = vmatpush.bf16.msra.mxu1 %v1153_v18  ;;  %1162 = vmatpush.bf16.msra.mxu3 %v1153_v18  ;;  %v1142_v23 = vld [vmem:[%s1392_s12 + $0x20] sm:$0xff]  ;;  %v1141_v25 = vld [vmem:[%s1392_s12 + $0x18] sm:$0xff]  ;;  %v1140_v27 = vld [vmem:[%s1392_s12 + $0x10] sm:$0xff] }
  0x43   : > { %v1150_v24 = vld [vmem:[%s1392_s12 + $0x60] sm:$0xff]  ;;  %v1149_v26 = vld [vmem:[%s1392_s12 + $0x58] sm:$0xff]  ;;  %v1148_v28 = vld [vmem:[%s1392_s12 + $0x50] sm:$0xff] }
  0x44   : > { %v1139_v29 = vld [vmem:[%s1392_s12 + $0x8] sm:$0xff]  ;;  %v1138_v31 = vld [vmem:[%s1392_s12] sm:$0xff]  ;;  %v998_v45 = vld [vmem:[%s1394_s13 + $0x10] sm:$0xf] }
  0x45   : > { %636 = vmatpush.bf16.msra.mxu0 %v1144_v19  ;;  %1155 = vmatpush.bf16.msra.mxu2 %v1144_v19  ;;  %v1147_v30 = vld [vmem:[%s1392_s12 + $0x48] sm:$0xff]  ;;  %v1146_v32 = vld [vmem:[%s1392_s12 + $0x40] sm:$0xff]  ;;  %v1125_v46 = vld [vmem:[%s1394_s13 + $0x14] sm:$0xf0] }
  0x46   : > { %685 = vmatpush.bf16.msra.mxu1 %v1152_v20  ;;  %1163 = vmatpush.bf16.msra.mxu3 %v1152_v20  ;;  %v990_v33 = vld [vmem:[%s1394_s13] sm:$0xf]  ;;  %v1123_v34 = vld [vmem:[%s1394_s13 + $0x4] sm:$0xf0]  ;;  %v1122_v37 = vld [vmem:[%s1394_s13 + $0x4] sm:$0xf]  ;;  %v999_v53 = vor.u32 %v1125_v46, %v998_v45 }
  0x47   : > { %v1022_v35 = vld [vmem:[%s1394_s13 + $0x40] sm:$0xf]  ;;  %v1131_v36 = vld [vmem:[%s1394_s13 + $0x44] sm:$0xf0]  ;;  %v992_v38 = vld [vmem:[%s1394_s13 + $0x8] sm:$0xf0]  ;;  %v991_v41 = vor.u32 %v1123_v34, %v990_v33 }
  0x48   : > { %v1130_v39 = vld [vmem:[%s1394_s13 + $0x44] sm:$0xf]  ;;  %v1024_v40 = vld [vmem:[%s1394_s13 + $0x48] sm:$0xf0]  ;;  %v1023_v42 = vor.u32 %v1131_v36, %v1022_v35  ;;  %v995_v43 = vor.u32 %v1122_v37, %v992_v38  ;;  %v1030_v47 = vld [vmem:[%s1394_s13 + $0x50] sm:$0xf] }
  0x49   : > { %637 = vmatpush.bf16.msra.mxu0 %v1143_v21  ;;  %1156 = vmatpush.bf16.msra.mxu2 %v1143_v21  ;;  %v1027_v44 = vor.u32 %v1130_v39, %v1024_v40  ;;  %v1133_v48 = vld [vmem:[%s1394_s13 + $0x54] sm:$0xf0]  ;;  %v1124_v49 = vld [vmem:[%s1394_s13 + $0x14] sm:$0xf]  ;;  %v1000_v50 = vld [vmem:[%s1394_s13 + $0x18] sm:$0xf0] }
  0x4a   : > { %686 = vmatpush.bf16.msra.mxu1 %v1151_v22  ;;  %1164 = vmatpush.bf16.msra.mxu3 %v1151_v22  ;;  %v1132_v51 = vld [vmem:[%s1394_s13 + $0x54] sm:$0xf]  ;;  %v1032_v52 = vld [vmem:[%s1394_s13 + $0x58] sm:$0xf0]  ;;  %v1031_v54 = vor.u32 %v1133_v48, %v1030_v47  ;;  %v1003_v55 = vor.u32 %v1124_v49, %v1000_v50  ;;  %v1006_v57 = vld [vmem:[%s1394_s13 + $0x20] sm:$0xf] }
  0x4b   : > { %v1035_v56 = vor.u32 %v1132_v51, %v1032_v52  ;;  %v1127_v58 = vld [vmem:[%s1394_s13 + $0x24] sm:$0xf0]  ;;  %v1038_v59 = vld [vmem:[%s1394_s13 + $0x60] sm:$0xf]  ;;  %v1126_v61 = vld [vmem:[%s1394_s13 + $0x24] sm:$0xf] }
  0x4c   : > { %v1135_v60 = vld [vmem:[%s1394_s13 + $0x64] sm:$0xf0]  ;;  %v1008_v62 = vld [vmem:[%s1394_s13 + $0x28] sm:$0xf0]  ;;  %v1134_v63 = vld [vmem:[%s1394_s13 + $0x64] sm:$0xf]  ;;  %v1007_v1 = vor.u32 %v1127_v58, %v1006_v57 }
  0x4d   : > { %638 = vmatpush.bf16.msra.mxu0 %v1142_v23  ;;  %1157 = vmatpush.bf16.msra.mxu2 %v1142_v23  ;;  %v1040_v0 = vld [vmem:[%s1394_s13 + $0x68] sm:$0xf0]  ;;  %v1039_v2 = vor.u32 %v1135_v60, %v1038_v59  ;;  %v1011_v3 = vor.u32 %v1126_v61, %v1008_v62  ;;  %v1014_v5 = vld [vmem:[%s1394_s13 + $0x30] sm:$0xf]  ;;  %v1129_v6 = vld [vmem:[%s1394_s13 + $0x34] sm:$0xf0] }
  0x4e   : > { %687 = vmatpush.bf16.msra.mxu1 %v1150_v24  ;;  %1165 = vmatpush.bf16.msra.mxu3 %v1150_v24  ;;  %v1043_v4 = vor.u32 %v1134_v63, %v1040_v0  ;;  %v1046_v7 = vld [vmem:[%s1394_s13 + $0x70] sm:$0xf]  ;;  %v1137_v8 = vld [vmem:[%s1394_s13 + $0x74] sm:$0xf0]  ;;  %v1128_v9 = vld [vmem:[%s1394_s13 + $0x34] sm:$0xf]  ;;  %v1015_v13 = vor.u32 %v1129_v6, %v1014_v5 }
  0x4f   : > { %v1016_v10 = vld [vmem:[%s1394_s13 + $0x38] sm:$0xf0]  ;;  %v1136_v11 = vld [vmem:[%s1394_s13 + $0x74] sm:$0xf]  ;;  %v1047_v14 = vor.u32 %v1137_v8, %v1046_v7  ;;  %v403_v23 = vld [vmem:[#allocation2 + $0x40] sm:$0xff] }
  0x50   : > { %v1048_v12 = vld [vmem:[%s1394_s13 + $0x78] sm:$0xf0]  ;;  %v1019_v15 = vor.u32 %v1128_v9, %v1016_v10  ;;  %v395_v18 = vld [vmem:[#allocation2 + $0x30] sm:$0xff]  ;;  %v404_v33 = vld [vmem:[#allocation2 + $0x20] sm:$0xff] }
  0x51   : > { %639 = vmatpush.bf16.msra.mxu0 %v1141_v25  ;;  %1158 = vmatpush.bf16.msra.mxu2 %v1141_v25  ;;  %v1051_v16 = vor.u32 %v1136_v11, %v1048_v12  ;;  %v397_v37 = vld [vmem:[#allocation2 + $0x58] sm:$0xff]  ;;  %v399_v57 = vld [vmem:[#allocation2 + $0x50] sm:$0xff]  ;;  %v407_v63 = vld [vmem:[#allocation2 + $0x60] sm:$0xff] }
  0x52   : > { %688 = vmatpush.bf16.msra.mxu1 %v1149_v26  ;;  %1166 = vmatpush.bf16.msra.mxu3 %v1149_v26  ;;  %v398_v47 = vld [vmem:[#allocation2 + $0x18] sm:$0xff]  ;;  %v408_v9 = vld [vmem:[#allocation2 + $0x70] sm:$0xff] }
  0x55   : > { %640 = vmatpush.bf16.msra.mxu0 %v1140_v27  ;;  %1159 = vmatpush.bf16.msra.mxu2 %v1140_v27  ;;  %v396_v27 = vld [vmem:[#allocation2] sm:$0xff] }
  0x56   : > { %689 = vmatpush.bf16.msra.mxu1 %v1148_v28  ;;  %1167 = vmatpush.bf16.msra.mxu3 %v1148_v28 }
  0x59   : > { %641 = vmatpush.bf16.msra.mxu0 %v1139_v29  ;;  %1160 = vmatpush.bf16.msra.mxu2 %v1139_v29 }
  0x5a   : > { %690 = vmatpush.bf16.msra.mxu1 %v1147_v30  ;;  %1168 = vmatpush.bf16.msra.mxu3 %v1147_v30 }
  0x5d   : > { %642 = vmatpush.bf16.msra.mxu0 %v1138_v31  ;;  %1161 = vmatpush.bf16.msra.mxu2 %v1138_v31 }
  0x5e   : > { %691 = vmatpush.bf16.msra.mxu1 %v1146_v32  ;;  %1169 = vmatpush.bf16.msra.mxu3 %v1146_v32 }
  0x60   : > { %643 = vmatmul.bf16.vlgmr.msra.gmra.mxu0 %v991_v41  ;;  %663 = vmatmul.bf16.vlgmr.msra.gmra.mxu2 %v1023_v42 }
  0x61   : > { %692 = vmatmul.bf16.vlgmr.msra.gmra.mxu1 %v995_v43  ;;  %712 = vmatmul.bf16.vlgmr.msra.gmra.mxu3 %v1027_v44  ;;  %v405_v43 = vld [vmem:[#allocation2 + $0x10] sm:$0xff] }
  0x70   : > { %648 = vmatmul.bf16.gmra.mxu0 %v999_v53  ;;  %668 = vmatmul.bf16.gmra.mxu2 %v1031_v54  ;;  %v406_v53 = vld [vmem:[#allocation2 + $0x38] sm:$0xff] }
  0x71   : > { %697 = vmatmul.bf16.gmra.mxu1 %v1003_v55  ;;  %717 = vmatmul.bf16.gmra.mxu3 %v1035_v56 }
  0x80   : > { %653 = vmatmul.bf16.gmra.mxu0 %v1007_v1  ;;  %673 = vmatmul.bf16.gmra.mxu2 %v1039_v2 }
  0x81   : > { %702 = vmatmul.bf16.gmra.mxu1 %v1011_v3  ;;  %722 = vmatmul.bf16.gmra.mxu3 %v1043_v4  ;;  %v400_v3 = vld [vmem:[#allocation2 + $0x68] sm:$0xff] }
  0x90   : > { %658 = vmatmul.bf16.gmra.mxu0 %v1015_v13  ;;  %678 = vmatmul.bf16.gmra.mxu2 %v1047_v14  ;;  %v401_v13 = vld [vmem:[#allocation2 + $0x8] sm:$0xff] }
  0x91   : > { %707 = vmatmul.bf16.gmra.mxu1 %v1019_v15  ;;  %727 = vmatmul.bf16.gmra.mxu3 %v1051_v16 }
  0xdd   : > { %v644_v17 = vpop.f32.mrf.mxu0 }
  0xde   : > { %v693_v19 = vpop.f32.mrf.mxu1 }
  0xdf   : > { %v694_v20 = vadd.f32 %v693_v19, %v644_v17  ;;  %v409_v19 = vld [vmem:[#allocation2 + $0x78] sm:$0xff] }
  0xe1   : > { %v733_v21 = vadd.f32 %v694_v20, %v395_v18 }
  0xe3   : > { %749 = vst [vmem:[#allocation2 + $0x30] sm:$0xff] %v733_v21  ;;  %v664_v22 = vpop.f32.mrf.mxu2 }
  0xe4   : > { %v713_v24 = vpop.f32.mrf.mxu3 }
  0xe5   : > { %v714_v25 = vadd.f32 %v713_v24, %v664_v22  ;;  %v646_v26 = vpop.f32.mrf.mxu0 }
  0xe6   : > { %v695_v28 = vpop.f32.mrf.mxu1 }
  0xe7   : > { %v741_v29 = vadd.f32 %v714_v25, %v403_v23  ;;  %v696_v30 = vadd.f32 %v695_v28, %v646_v26  ;;  %v402_v23 = vld [vmem:[#allocation2 + $0x48] sm:$0xff] }
  0xe9   : > { %757 = vst [vmem:[#allocation2 + $0x40] sm:$0xff] %v741_v29  ;;  %v734_v31 = vadd.f32 %v696_v30, %v396_v27  ;;  %v410_v29 = vld [vmem:[#allocation2 + $0x28] sm:$0xff] }
  0xeb   : > { %750 = vst [vmem:[#allocation2] sm:$0xff] %v734_v31  ;;  %v666_v32 = vpop.f32.mrf.mxu2 }
  0xec   : > { %v715_v34 = vpop.f32.mrf.mxu3 }
  0xed   : > { %v716_v35 = vadd.f32 %v715_v34, %v666_v32  ;;  %v649_v36 = vpop.f32.mrf.mxu0 }
  0xee   : > { %v698_v38 = vpop.f32.mrf.mxu1 }
  0xef   : > { %v742_v39 = vadd.f32 %v716_v35, %v404_v33  ;;  %v699_v40 = vadd.f32 %v698_v38, %v649_v36 }
  0xf1   : > { %758 = vst [vmem:[#allocation2 + $0x20] sm:$0xff] %v742_v39  ;;  %v735_v41 = vadd.f32 %v699_v40, %v397_v37 }
  0xf3   : > { %751 = vst [vmem:[#allocation2 + $0x58] sm:$0xff] %v735_v41  ;;  %v669_v42 = vpop.f32.mrf.mxu2 }
  0xf4   : > { %v718_v44 = vpop.f32.mrf.mxu3 }
  0xf5   : > { %v719_v45 = vadd.f32 %v718_v44, %v669_v42  ;;  %v651_v46 = vpop.f32.mrf.mxu0 }
  0xf6   : > { %v700_v48 = vpop.f32.mrf.mxu1 }
  0xf7   : > { %v743_v49 = vadd.f32 %v719_v45, %v405_v43  ;;  %v701_v50 = vadd.f32 %v700_v48, %v651_v46 }
  0xf9   : > { %759 = vst [vmem:[#allocation2 + $0x10] sm:$0xff] %v743_v49  ;;  %v736_v51 = vadd.f32 %v701_v50, %v398_v47 }
  0xfb   : > { %752 = vst [vmem:[#allocation2 + $0x18] sm:$0xff] %v736_v51  ;;  %v671_v52 = vpop.f32.mrf.mxu2 }
  0xfc   : > { %v720_v54 = vpop.f32.mrf.mxu3 }
  0xfd   : > { %v721_v55 = vadd.f32 %v720_v54, %v671_v52  ;;  %v654_v56 = vpop.f32.mrf.mxu0 }
  0xfe   : > { %v703_v58 = vpop.f32.mrf.mxu1 }
  0xff   : > { %v744_v59 = vadd.f32 %v721_v55, %v406_v53  ;;  %v704_v60 = vadd.f32 %v703_v58, %v654_v56 }
 0x101   : > { %760 = vst [vmem:[#allocation2 + $0x38] sm:$0xff] %v744_v59  ;;  %v737_v61 = vadd.f32 %v704_v60, %v399_v57 }
 0x103   : > { %753 = vst [vmem:[#allocation2 + $0x50] sm:$0xff] %v737_v61  ;;  %v674_v62 = vpop.f32.mrf.mxu2 }
 0x104   : > { %v723_v0 = vpop.f32.mrf.mxu3 }
 0x105   : > { %v724_v1 = vadd.f32 %v723_v0, %v674_v62  ;;  %v656_v2 = vpop.f32.mrf.mxu0 }
 0x106   : > { %v705_v4 = vpop.f32.mrf.mxu1 }
 0x107   : > { %v745_v5 = vadd.f32 %v724_v1, %v407_v63  ;;  %v706_v6 = vadd.f32 %v705_v4, %v656_v2 }
 0x109   : > { %761 = vst [vmem:[#allocation2 + $0x60] sm:$0xff] %v745_v5  ;;  %v738_v7 = vadd.f32 %v706_v6, %v400_v3 }
 0x10b   : > { %754 = vst [vmem:[#allocation2 + $0x68] sm:$0xff] %v738_v7  ;;  %v676_v8 = vpop.f32.mrf.mxu2 }
 0x10c   : > { %v725_v10 = vpop.f32.mrf.mxu3 }
 0x10d   : > { %v726_v11 = vadd.f32 %v725_v10, %v676_v8  ;;  %v659_v12 = vpop.f32.mrf.mxu0 }
 0x10e   : > { %v708_v14 = vpop.f32.mrf.mxu1 }
 0x10f   : > { %v746_v15 = vadd.f32 %v726_v11, %v408_v9  ;;  %v709_v16 = vadd.f32 %v708_v14, %v659_v12 }
 0x111   : > { %762 = vst [vmem:[#allocation2 + $0x70] sm:$0xff] %v746_v15  ;;  %v739_v17 = vadd.f32 %v709_v16, %v401_v13 }
 0x113   : > { %755 = vst [vmem:[#allocation2 + $0x8] sm:$0xff] %v739_v17  ;;  %v679_v18 = vpop.f32.mrf.mxu2 }
 0x114   : > { %v728_v20 = vpop.f32.mrf.mxu3 }
 0x115   : > { %v729_v21 = vadd.f32 %v728_v20, %v679_v18  ;;  %v661_v22 = vpop.f32.mrf.mxu0 }
 0x116   : > { %v710_v24 = vpop.f32.mrf.mxu1 }
 0x117   : > { %v747_v25 = vadd.f32 %v729_v21, %v409_v19  ;;  %v711_v26 = vadd.f32 %v710_v24, %v661_v22 }
 0x119   : > { %763 = vst [vmem:[#allocation2 + $0x78] sm:$0xff] %v747_v25  ;;  %v740_v27 = vadd.f32 %v711_v26, %v402_v23 }
 0x11b   : > { %756 = vst [vmem:[#allocation2 + $0x48] sm:$0xff] %v740_v27  ;;  %v681_v28 = vpop.f32.mrf.mxu2 }
 0x11c   : > { %v730_v30 = vpop.f32.mrf.mxu3 }
 0x11d   : > { %v731_v31 = vadd.f32 %v730_v30, %v681_v28  ;;  %768 = sbr.rel (%p1116_p11) target bundleno = 313 (0x139), region = 82 }
 0x11f   : > { %v748_v32 = vadd.f32 %v731_v31, %v410_v29 }
 0x121   : > { %764 = vst [vmem:[#allocation2 + $0x28] sm:$0xff] %v748_v32 }
 0x122   : > { %v769_v33 = vld [vmem:[#allocation2 + $0x30] sm:$0xff]  ;;  %v1220_v34 = vld [vmem:[%s1492_s2] ss:$0 sm:$0xff]  ;;  %v771_v39 = vld [vmem:[#allocation2 + $0x58] sm:$0xff] }
 0x123   : > { %v1452_v35 = vld [vmem:[%s1493_s3] ss:$0 sm:$0xff]  ;;  %v789_v37 = vmul.f32 %v1220_v34, %v769_v33  ;;  %v772_v40 = vld [vmem:[#allocation2 + $0x18] sm:$0xff]  ;;  %v773_v41 = vld [vmem:[#allocation2 + $0x50] sm:$0xff]  ;;  %v791_v42 = vmul.f32 %v1220_v34, %v771_v39 }
 0x124   : > { %v770_v36 = vld [vmem:[#allocation2] sm:$0xff]  ;;  %v792_v43 = vmul.f32 %v1220_v34, %v772_v40  ;;  %v793_v44 = vmul.f32 %v1220_v34, %v773_v41  ;;  %v774_v45 = vld [vmem:[#allocation2 + $0x68] sm:$0xff]  ;;  %v779_v62 = vld [vmem:[#allocation2 + $0x10] sm:$0xff] }
 0x125   : > { %v790_v38 = vmul.f32 %v1220_v34, %v770_v36  ;;  %v775_v46 = vld [vmem:[#allocation2 + $0x8] sm:$0xff]  ;;  %v809_v48 = vadd.f32 %v1452_v35, %v789_v37  ;;  %v794_v50 = vmul.f32 %v1220_v34, %v774_v45  ;;  %v811_v52 = vadd.f32 %v1452_v35, %v791_v42  ;;  %v777_v56 = vld [vmem:[#allocation2 + $0x40] sm:$0xff]  ;;  %v780_v63 = vld [vmem:[#allocation2 + $0x38] sm:$0xff] }
 0x126   : > { %v776_v47 = vld [vmem:[#allocation2 + $0x48] sm:$0xff]  ;;  %v795_v51 = vmul.f32 %v1220_v34, %v775_v46  ;;  %v812_v53 = vadd.f32 %v1452_v35, %v792_v43  ;;  %v813_v54 = vadd.f32 %v1452_v35, %v793_v44  ;;  %v778_v57 = vld [vmem:[#allocation2 + $0x20] sm:$0xff]  ;;  %v782_v4 = vld [vmem:[#allocation2 + $0x70] sm:$0xff]  ;;  %v797_v8 = vmul.f32 %v1220_v34, %v777_v56 }
 0x127   : > { %v810_v49 = vadd.f32 %v1452_v35, %v790_v38  ;;  %v796_v55 = vmul.f32 %v1220_v34, %v776_v47  ;;  %v825_v58 = vmax.f32 %v809_v48, 0.0  ;;  %v814_v60 = vadd.f32 %v1452_v35, %v794_v50  ;;  %v781_v0 = vld [vmem:[#allocation2 + $0x60] sm:$0xff]  ;;  %v783_v5 = vld [vmem:[#allocation2 + $0x78] sm:$0xff] }
 0x128   : > { %v815_v61 = vadd.f32 %v1452_v35, %v795_v51  ;;  %v827_v1 = vmax.f32 %v811_v52, 0.0  ;;  %v828_v2 = vmax.f32 %v812_v53, 0.0  ;;  %v829_v6 = vmax.f32 %v813_v54, 0.0  ;;  %v784_v10 = vld [vmem:[#allocation2 + $0x28] sm:$0xff] }
 0x129   : > { %v826_v59 = vmax.f32 %v810_v49, 0.0  ;;  %v816_v3 = vadd.f32 %v1452_v35, %v796_v55  ;;  %841 = vst [vmem:[#allocation4] sm:$0xff] %v825_v58  ;;  %v830_v7 = vmax.f32 %v814_v60, 0.0  ;;  %v798_v9 = vmul.f32 %v1220_v34, %v778_v57 }
 0x12a   : > { %v831_v11 = vmax.f32 %v815_v61, 0.0  ;;  %v799_v12 = vmul.f32 %v1220_v34, %v779_v62  ;;  %v800_v13 = vmul.f32 %v1220_v34, %v780_v63  ;;  %v801_v14 = vmul.f32 %v1220_v34, %v781_v0  ;;  %843 = vst [vmem:[#allocation4 + $0x10] sm:$0xff] %v827_v1 }
 0x12b   : > { %842 = vst [vmem:[#allocation4 + $0x8] sm:$0xff] %v826_v59  ;;  %v817_v15 = vadd.f32 %v1452_v35, %v797_v8  ;;  %v818_v16 = vadd.f32 %v1452_v35, %v798_v9  ;;  %v802_v17 = vmul.f32 %v1220_v34, %v782_v4  ;;  %v803_v18 = vmul.f32 %v1220_v34, %v783_v5 }
 0x12c   : > { %844 = vst [vmem:[#allocation4 + $0x18] sm:$0xff] %v828_v2  ;;  %v832_v19 = vmax.f32 %v816_v3, 0.0  ;;  %v819_v20 = vadd.f32 %v1452_v35, %v799_v12  ;;  %v820_v21 = vadd.f32 %v1452_v35, %v800_v13  ;;  %v804_v22 = vmul.f32 %v1220_v34, %v784_v10 }
 0x12d   : > { %845 = vst [vmem:[#allocation4 + $0x20] sm:$0xff] %v829_v6  ;;  %v833_v23 = vmax.f32 %v817_v15, 0.0  ;;  %v821_v24 = vadd.f32 %v1452_v35, %v801_v14  ;;  %v834_v25 = vmax.f32 %v818_v16, 0.0  ;;  %v822_v26 = vadd.f32 %v1452_v35, %v802_v17 }
 0x12e   : > { %846 = vst [vmem:[#allocation4 + $0x28] sm:$0xff] %v830_v7  ;;  %v835_v27 = vmax.f32 %v819_v20, 0.0  ;;  %v823_v28 = vadd.f32 %v1452_v35, %v803_v18  ;;  %v836_v29 = vmax.f32 %v820_v21, 0.0  ;;  %v824_v30 = vadd.f32 %v1452_v35, %v804_v22 }
 0x12f   : > { %847 = vst [vmem:[#allocation4 + $0x30] sm:$0xff] %v831_v11  ;;  %v837_v31 = vmax.f32 %v821_v24, 0.0  ;;  %v838_v32 = vmax.f32 %v822_v26, 0.0 }
 0x130   : > { %848 = vst [vmem:[#allocation4 + $0x38] sm:$0xff] %v832_v19  ;;  %v839_v33 = vmax.f32 %v823_v28, 0.0  ;;  %v840_v34 = vmax.f32 %v824_v30, 0.0 }
 0x131   : > { %849 = vst [vmem:[#allocation4 + $0x40] sm:$0xff] %v833_v23 }
 0x132   : > { %850 = vst [vmem:[#allocation4 + $0x48] sm:$0xff] %v834_v25 }
 0x133   : > { %851 = vst [vmem:[#allocation4 + $0x50] sm:$0xff] %v835_v27 }
 0x134   : > { %852 = vst [vmem:[#allocation4 + $0x58] sm:$0xff] %v836_v29 }
 0x135   : > { %853 = vst [vmem:[#allocation4 + $0x60] sm:$0xff] %v837_v31 }
 0x136   : > { %854 = vst [vmem:[#allocation4 + $0x68] sm:$0xff] %v838_v32 }
 0x137   : > { %855 = vst [vmem:[#allocation4 + $0x70] sm:$0xff] %v839_v33 }
 0x138   : > { %856 = vst [vmem:[#allocation4 + $0x78] sm:$0xff] %v840_v34 }
 0x139 PF: > { %p1174_p12 = scmp.eq.s32.totalorder %s975_s20, 2  ;;  %s868_s26 = sshll.u32 %s1494_s4, 4  ;;  %s869_s26 = int_to_ptr.hbm [resolvable:$true] %s868_s26 }
 0x13a   : > { %s1295_s27 = smov [#allocation4]   ;;  %s1296_s29 = smov 128  }
 0x13b   : > { %s866_s28 = sshll.u32 %s1295_s27, 4  ;;  %s1297_s30 = smov 8   ;;  %s867_s28 = int_to_ptr.vmem [resolvable:$true] %s866_s28 }
 0x13c   : > { %1171 = dma.vmem_to_hbm [thread:$0]  (%p1174_p12), %s867_s28, 2048, %s869_s26, [#allocation5], %s1296_s29, %s1296_s29, %s1297_s30  }
 0x13d   : > { %1271 = dma.done.wait (%p1174_p12), [#allocation5], 2048  }
 0x13e   : > { %1273 = vsyncadd (%p1174_p12), [#allocation5], 4294965248 }
 0x13f PF: > { %s15_s19 = sadd.s32 1, %s1292_s19   ;;  %s1495_s15 = smov %s1280_s16 }
 0x140   : > { %p12_p13 = scmp.ge.s32.totalorder %s15_s19, 5   ;;  %s1496_s16 = smov %s1359_s24 }
 0x141   : > { %s1497_s17 = smov %s1288_s18  ;;  %s1498_s18 = smov %s1500_s21 }
 0x142   :  { %14 = sbr.rel (!%p12_p13) target bundleno = 3 (0x3), region = 124 }
 0x147   :  { %885 = vsyncpa [#allocation5], 1 }
 0x148   :  { %887 = vsyncpa [#allocation5 + $0x1], 1 }

</bundles_post_ra>
